<compile_context>
chip_gen: v5e
topology: v5e:2x2
jax: 0.10.0
libtpu: 0.0.40
codegen_flags: <defaults>
</compile_context>

<pallas_src>
import math

import jax
import jax.numpy as jnp
from jax.experimental import pallas as pl
from jax.experimental.pallas import tpu as pltpu


def _centralize_kernel(x_ref, o_ref):
    # Block is (TB, K, TM). Center = the k == 0 row of each batch in the
    # tile, read as a narrow ref slice (sublane-broadcast load) rather than
    # a slice of the already-loaded value.
    o_ref[...] = x_ref[...] - x_ref[:, 0:1, :]


def _vmem_capacity_bytes():
    try:
        info = pltpu.get_tpu_info()
        cap = getattr(info, "vmem_capacity_bytes", None)
        if cap:
            return int(cap)
    except Exception:
        pass
    return 64 << 20  # conservative: assume the smallest (v7x) VMEM


def _largest_divisor_leq(n, cap):
    cap = max(1, min(n, cap))
    for d in range(cap, 0, -1):
        if n % d == 0:
            return d
    return 1


def _pick_tb(B, max_tb):
    """Batches per block: prefer a divisor of B (no ragged tail blocks)."""
    if max_tb >= B:
        return B
    max_tb = max(1, max_tb)
    d = _largest_divisor_leq(B, max_tb)
    # Only take the divisor if it keeps the block reasonably large.
    return d if 2 * d >= max_tb else max_tb


def _pick_tm(M_work, max_tm):
    """Lane tile (multiple of 128): prefer a divisor of M_work."""
    if max_tm >= M_work:
        return M_work
    blocks, cap_blocks = M_work // 128, max(1, max_tm // 128)
    d = _largest_divisor_leq(blocks, cap_blocks)
    return d * 128 if 2 * d * 128 >= max_tm else cap_blocks * 128


def centralize_edge_features(x, *, target_block_bytes=None,
                             vmem_limit_bytes=None, donate=False):
    """x: [B, K, *rest] -> x - x[:, 0, None, ...]  via a Pallas TPU kernel."""
    assert x.ndim >= 3, "expected at least (batch, k, feature...) dims"
    B, K = x.shape[0], x.shape[1]
    M = int(math.prod(x.shape[2:]))
    x2 = x.reshape(B, K, M)                 # contiguous collapse: free
    itemsize = x2.dtype.itemsize

    # Sublane padding of the K (second-to-last) axis inside VMEM.
    sublane = {4: 8, 2: 16, 1: 32}.get(itemsize, 8)
    K_pad = -(-K // sublane) * sublane

    # --- Per-generation VMEM budget --------------------------------------
    cap = _vmem_capacity_bytes()
    if vmem_limit_bytes is None:
        # 96 MiB on 128 MiB parts (v5e/v6e), ~48 MiB on v7x's 64 MiB.
        vmem_limit_bytes = min(96 << 20, (cap * 3) // 4)
    vmem_limit_bytes = int(vmem_limit_bytes)
    if target_block_bytes is None:
        # Real footprint = (in + out) x 2 pipeline buffers = 4 copies of the
        # block; keep ~20% headroom.  Lands at ~10 MiB blocks on v7x and
        # ~16 MiB on v5e/v6e.
        per_block = min(16 << 20, (vmem_limit_bytes * 4 // 5) // 4)
    else:
        per_block = int(target_block_bytes)
    per_block = max(per_block, 1)

    # --- Tile selection (budget uses the K-sublane-padded footprint) -----
    row_bytes = K_pad * itemsize            # one lane column of one batch
    slab_bytes = row_bytes * M              # one full batch slab in VMEM

    if slab_bytes <= per_block:
        # Whole lane axis per block; fold several batches per grid step.
        M_work, pad = M, 0
        TM = M
        TB = _pick_tb(B, per_block // slab_bytes)
    else:
        # Tile the lane axis in 128-multiples; pad M once if needed so the
        # tiling stays legal and stores stay full-lane unmasked.
        TB = 1
        M_work = -(-M // 128) * 128
        pad = M_work - M
        max_tm = max(128, (per_block // row_bytes) // 128 * 128)
        TM = _pick_tm(M_work, max_tm)

    grid_b = pl.cdiv(B, TB)
    grid_m = pl.cdiv(M_work, TM)

    # Keep >= 2 grid steps (when the problem is big enough to matter) so the
    # parallel axes can shard across both TensorCores on v7x.
    if grid_b * grid_m < 2 and B * K * M * itemsize >= (1 << 20):
        if B >= 2:
            TB = _pick_tb(B, -(-B // 2))
            grid_b = pl.cdiv(B, TB)
        elif M_work % 128 == 0 and M_work >= 256:
            TM = _pick_tm(M_work, max(128, (M_work // 2) // 128 * 128))
            grid_m = pl.cdiv(M_work, TM)

    if pad:
        # Padded lanes are zeros; 0 - 0 = 0 and they are sliced off below.
        x2 = jnp.pad(x2, ((0, 0), (0, 0), (0, pad)))

    if grid_m == 1:
        grid = (grid_b,)
        index_map = lambda b: (b, 0, 0)
        semantics = ("parallel",)
    else:
        grid = (grid_b, grid_m)
        index_map = lambda b, m: (b, 0, m)
        semantics = ("parallel", "parallel")

    out = pl.pallas_call(
        _centralize_kernel,
        out_shape=jax.ShapeDtypeStruct((B, K, M_work), x2.dtype),
        grid_spec=pl.GridSpec(
            grid=grid,
            in_specs=[pl.BlockSpec((TB, K, TM), index_map)],
            out_specs=pl.BlockSpec((TB, K, TM), index_map),
        ),
        compiler_params=pltpu.CompilerParams(
            dimension_semantics=semantics,
            vmem_limit_bytes=vmem_limit_bytes,
        ),
        cost_estimate=pl.CostEstimate(
            flops=B * K * M,
            bytes_accessed=2 * B * K * M_work * itemsize,
            transcendentals=0,
        ),
        # Opt-in: donate the input HBM buffer if the caller no longer needs x.
        input_output_aliases={0: 0} if donate else {},
    )(x2)

    if pad:
        out = out[:, :, :M]
    return out.reshape(x.shape)


def _check(x, **kwargs):
    out = jax.block_until_ready(centralize_edge_features(x, **kwargs))
    ref = x - x[:, 0:1]
    assert out.shape == x.shape
    assert out.dtype == x.dtype
    assert jnp.allclose(out, ref, atol=1e-6), "mismatch vs reference"


if __name__ == "__main__":
    key = jax.random.PRNGKey(0)
    k0, k1, k2, k3 = jax.random.split(key, 4)

    # DGCNN-like small shape (d=3, k=20 neighbors); lane axis N*D=48 (<128):
    # full-dim block, batches folded.
    _check(jax.random.normal(k0, (2, 20, 16, 3), dtype=jnp.float32))

    # Lane-dense case (N*D multiple of 128), batches folded into one block.
    _check(jax.random.normal(k1, (2, 20, 128, 3), dtype=jnp.float32))

    # Force the lane-axis-tiled + pad-to-128 path (M=300 -> 384, TM=128).
    _check(jax.random.normal(k2, (1, 4, 100, 3), dtype=jnp.float32),
           target_block_bytes=8192)

    # Slab big enough that the >=2-grid-step (megacore) split kicks in.
    _check(jax.random.normal(k3, (2, 16, 4096, 3), dtype=jnp.float32))

    print("KERNEL_OK")
</pallas_src>

<mosaic_0001>
module attributes {stable_mosaic.version = 11 : i64} {
  func.func @_centralize_kernel(%arg0: i32, %arg1: memref<2x20x48xf32, #tpu.memory_space<vmem>>, %arg2: memref<2x20x48xf32, #tpu.memory_space<vmem>>) attributes {dimension_semantics = [#tpu.dimension_semantics<parallel>], iteration_bounds = array<i64: 1>, scalar_prefetch = 0 : i64, scratch_operands = 0 : i64, tpu.core_type = #tpu.core_type<tc>, window_params = [{transform_indices = @transform_0, window_bounds = array<i64: 2, 20, 48>}, {transform_indices = @transform_1, window_bounds = array<i64: 2, 20, 48>}]} {
    %c0 = arith.constant 0 : index
    %c0_0 = arith.constant 0 : index
    %c0_1 = arith.constant 0 : index
    %0 = vector.load %arg1[%c0, %c0_0, %c0_1] : memref<2x20x48xf32, #tpu.memory_space<vmem>>, vector<2x20x48xf32>
    %c0_2 = arith.constant 0 : index
    %c0_3 = arith.constant 0 : index
    %c0_4 = arith.constant 0 : index
    %1 = vector.load %arg1[%c0_2, %c0_3, %c0_4] : memref<2x20x48xf32, #tpu.memory_space<vmem>>, vector<2x1x48xf32>
    %2 = vector.broadcast %1 : vector<2x1x48xf32> to vector<2x20x48xf32>
    %3 = arith.subf %0, %2 : vector<2x20x48xf32>
    %c0_5 = arith.constant 0 : index
    %c0_6 = arith.constant 0 : index
    %c0_7 = arith.constant 0 : index
    %4 = vector.load %arg2[%c0_5, %c0_6, %c0_7] : memref<2x20x48xf32, #tpu.memory_space<vmem>>, vector<2x20x48xf32>
    tpu.vector_store %arg2[%c0_5, %c0_6, %c0_7], %3 {strides = array<i32>} : memref<2x20x48xf32, #tpu.memory_space<vmem>>, vector<2x20x48xf32>,
    return
  }
  func.func @transform_0(%arg0: i32) -> (i32, i32, i32) {
    %c0_i32 = arith.constant 0 : i32
    %c0_i32_0 = arith.constant 0 : i32
    %c0_i32_1 = arith.constant 0 : i32
    return %arg0, %c0_i32, %c0_i32_0 : i32, i32, i32
  }
  func.func @transform_1(%arg0: i32) -> (i32, i32, i32) {
    %c0_i32 = arith.constant 0 : i32
    %c0_i32_0 = arith.constant 0 : i32
    %c0_i32_1 = arith.constant 0 : i32
    return %arg0, %c0_i32, %c0_i32_0 : i32, i32, i32
  }
}

</mosaic_0001>

<bundles_post_ra>
// kernel: tpu_custom_call.1
= control target key start
LH: loop header
LB: loop body
LE: loop exit
PB: predicated region body
PF: predicated region fallthrough
CT: control target
= control target key end

     0   :  { %vm24_vm0 = vcmask 392192   ;;  %vm27_vm1 = vcmask 388096   ;;  %s94_s0 = inlined_call_operand.vmem [shape: f32[2,20,48], index: 0, kind: input, shape index: {}]   ;;  %s95_s1 = inlined_call_operand.vmem [shape: f32[2,20,48], index: 1, kind: output, shape index: {}]  }
   0x1   :  { %v8_v0 = vld [vmem:[%s94_s0] sm:$0xff]  ;;  %v9_v2 = vld [vmem:[%s94_s0 + $0x8] sm:$0xff]  ;;  %v10_v3 = vld [vmem:[%s94_s0 + $0x10] sm:$0xf] }
   0x2   :  { %v36_v1 = vld [vmem:[%s94_s0] ss:$0 sm:$0xff]  ;;  %v11_v4 = vld [vmem:[%s94_s0 + $0x18] sm:$0xff]  ;;  %v13_v10 = vld [vmem:[%s94_s0 + $0x28] sm:$0xf] }
   0x3   :  { %v18_v5 = vsub.f32 %v8_v0, %v36_v1  ;;  %v19_v6 = vsub.f32 %v9_v2, %v36_v1  ;;  %v20_v7 = vsub.f32 %v10_v3, %v36_v1  ;;  %v37_v8 = vld [vmem:[%s94_s0 + $0x18] ss:$0 sm:$0xff]  ;;  %v12_v9 = vld [vmem:[%s94_s0 + $0x20] sm:$0xff] }
   0x4   :  { %v21_v11 = vsub.f32 %v11_v4, %v37_v8  ;;  %v22_v12 = vsub.f32 %v12_v9, %v37_v8  ;;  %v23_v13 = vsub.f32 %v13_v10, %v37_v8 }
   0x5   :  { %25 = vst.msk [vmem:[%s95_s1] sm:$0xff] %vm24_vm0, %v18_v5 }
   0x6   :  { %26 = vst.msk [vmem:[%s95_s1 + $0x8] sm:$0xff] %vm24_vm0, %v19_v6 }
   0x7   :  { %28 = vst.msk [vmem:[%s95_s1 + $0x10] sm:$0xf] %vm27_vm1, %v20_v7 }
   0x8   :  { %29 = vst.msk [vmem:[%s95_s1 + $0x18] sm:$0xff] %vm24_vm0, %v21_v11 }
   0x9   :  { %30 = vst.msk [vmem:[%s95_s1 + $0x20] sm:$0xff] %vm24_vm0, %v22_v12 }
   0xa   :  { %31 = vst.msk [vmem:[%s95_s1 + $0x28] sm:$0xf] %vm27_vm1, %v23_v13 }

</bundles_post_ra>
